<compile_context>
chip_gen: v5e
topology: v5e:2x2
jax: 0.10.0
libtpu: 0.0.40
codegen_flags: <defaults>
</compile_context>

<pallas_src>
import jax
import jax.numpy as jnp
from jax.experimental import pallas as pl
from jax.experimental.pallas import tpu as pltpu


def _round_up(x, m):
    return ((x + m - 1) // m) * m


def _wbce_partial_kernel(logits_ref, labels_ref, posw_ref, out_ref):
    """Per-batch-tile weighted-BCE partial sums.

    logits_ref/labels_ref : (TB, C) tile (TB a multiple of 8)
    posw_ref              : (1, C), resident across all grid steps
    out_ref               : (1, 8, C) lane-dense per-tile partial sums
    """
    x = logits_ref[...].astype(jnp.float32)          # (TB, C)
    y = labels_ref[...].astype(jnp.float32)          # (TB, C)
    pw = posw_ref[...].astype(jnp.float32)           # (1, C) -> broadcasts over rows

    # Numerically-stable BCE-with-logits (same form PyTorch uses).
    log_weight = 1.0 + (pw - 1.0) * y
    softplus_neg_abs = jnp.log1p(jnp.exp(-jnp.abs(x)))
    loss = (1.0 - y) * x + log_weight * (softplus_neg_abs + jnp.maximum(-x, 0.0))

    tb, c = loss.shape
    # Sublane-aligned partial reduce: (TB, C) -> (TB//8, 8, C) -> (8, C).
    # Pure vreg-wise VPU adds; the single cross-lane reduce happens once in the
    # wrapper on the tiny (num_tiles, 8, C) output.
    partial = jnp.sum(loss.reshape(tb // 8, 8, c), axis=0)
    out_ref[...] = partial.reshape(1, 8, c)


def weighted_factors(y_train):
    """pos_weight = (N - f) / f, f = per-class positive count (plain-JAX glue)."""
    f = jnp.sum(y_train.astype(jnp.float32), axis=0)          # [C]
    N = jnp.float32(y_train.shape[0])
    return (N - f) / f                                        # [C]


def weighted_bce_loss(logits, labels, pos_weight, *, target_tile_bytes=4 << 20):
    """mean BCE-with-logits with per-class pos_weight (torch reduction='mean')."""
    B, C = logits.shape
    itemsize = jnp.dtype(logits.dtype).itemsize

    # ---- choose batch tile: as large as ~target_tile_bytes allows, multiple
    #      of 8, balanced across tiles so padding stays small. ----
    b8 = _round_up(B, 8)
    max_rows = max(8, min(b8, (target_tile_bytes // max(1, C * itemsize)) // 8 * 8))
    num_tiles = -(-b8 // max_rows)
    tb = _round_up(-(-b8 // num_tiles), 8)
    b_pad = tb * num_tiles

    # ---- pad batch with loss-neutral rows (logits=-1e4, labels=0 => loss==0) ----
    if b_pad != B:
        pad = b_pad - B
        logits = jnp.concatenate(
            [logits, jnp.full((pad, C), -1e4, dtype=logits.dtype)], axis=0)
        labels = jnp.concatenate(
            [labels, jnp.zeros((pad, C), dtype=labels.dtype)], axis=0)

    pw2d = pos_weight.reshape(1, C).astype(jnp.float32)

    partials = pl.pallas_call(
        _wbce_partial_kernel,
        out_shape=jax.ShapeDtypeStruct((num_tiles, 8, C), jnp.float32),
        grid=(num_tiles,),
        in_specs=[
            pl.BlockSpec((tb, C), lambda i: (i, 0)),    # streamed logits tile
            pl.BlockSpec((tb, C), lambda i: (i, 0)),    # streamed labels tile
            pl.BlockSpec((1, C), lambda i: (0, 0)),     # pos_weight stays resident
        ],
        out_specs=pl.BlockSpec((1, 8, C), lambda i: (i, 0, 0)),
        compiler_params=pltpu.CompilerParams(
            dimension_semantics=("parallel",),          # megacore-shardable (v7x)
            vmem_limit_bytes=32 * 1024 * 1024,          # above v5e's 16 MiB default
        ),
    )(logits, labels, pw2d)

    # One tiny reduce + mean in plain XLA (once, not per tile). Divide by the
    # ORIGINAL element count, not the padded one.
    return jnp.sum(partials) / jnp.float32(B * C)


if __name__ == "__main__":
    key = jax.random.PRNGKey(0)
    k1, k2, k3 = jax.random.split(key, 3)

    B, C, N_TRAIN = 64, 128, 256

    # synthetic "training labels" used only to derive pos_weight; force each
    # class to have at least one positive so f > 0 (no div-by-zero).
    # TODO(synk): real data with zero-positive classes yields inf/nan pos_weight
    # (same behavior as the PyTorch module).
    y_train = (jax.random.uniform(k1, (N_TRAIN, C)) > 0.5).astype(jnp.float32)
    y_train = y_train.at[0].set(1.0)

    logits = jax.random.normal(k2, (B, C), dtype=jnp.float32)
    labels = (jax.random.uniform(k3, (B, C)) > 0.5).astype(jnp.float32)

    pos_weight = weighted_factors(y_train)

    loss = weighted_bce_loss(logits, labels, pos_weight)
    jax.block_until_ready(loss)

    # reference check in plain JAX
    lw = 1.0 + (pos_weight[None, :] - 1.0) * labels
    ref = jnp.mean((1.0 - labels) * logits
                   + lw * (jnp.log1p(jnp.exp(-jnp.abs(logits)))
                           + jnp.maximum(-logits, 0.0)))
    assert jnp.allclose(loss, ref, rtol=1e-5, atol=1e-5), (loss, ref)

    print("KERNEL_OK")
</pallas_src>

<mosaic_0001>
module attributes {stable_mosaic.version = 11 : i64} {
  func.func @_wbce_partial_kernel(%arg0: i32, %arg1: memref<64x128xf32, #tpu.memory_space<vmem>>, %arg2: memref<64x128xf32, #tpu.memory_space<vmem>>, %arg3: memref<1x128xf32, #tpu.memory_space<vmem>>, %arg4: memref<1x8x128xf32, #tpu.memory_space<vmem>>) attributes {dimension_semantics = [#tpu.dimension_semantics<parallel>], iteration_bounds = array<i64: 1>, scalar_prefetch = 0 : i64, scratch_operands = 0 : i64, tpu.core_type = #tpu.core_type<tc>, window_params = [{transform_indices = @transform_0, window_bounds = array<i64: 64, 128>}, {transform_indices = @transform_1, window_bounds = array<i64: 64, 128>}, {pipeline_mode = #tpu.pipeline_mode<synchronous>, transform_indices = @transform_2, window_bounds = array<i64: 1, 128>}, {transform_indices = @transform_3, window_bounds = array<i64: 1, 8, 128>}]} {
    %c0 = arith.constant 0 : index
    %c0_0 = arith.constant 0 : index
    %0 = vector.load %arg1[%c0, %c0_0] : memref<64x128xf32, #tpu.memory_space<vmem>>, vector<64x128xf32>
    %c0_1 = arith.constant 0 : index
    %c0_2 = arith.constant 0 : index
    %1 = vector.load %arg2[%c0_1, %c0_2] : memref<64x128xf32, #tpu.memory_space<vmem>>, vector<64x128xf32>
    %c0_3 = arith.constant 0 : index
    %c0_4 = arith.constant 0 : index
    %2 = vector.load %arg3[%c0_3, %c0_4] : memref<1x128xf32, #tpu.memory_space<vmem>>, vector<1x128xf32>
    %cst = arith.constant 1.000000e+00 : f32
    %3 = vector.broadcast %cst : f32 to vector<1x128xf32>
    %4 = arith.subf %2, %3 : vector<1x128xf32>
    %5 = vector.broadcast %4 : vector<1x128xf32> to vector<64x128xf32>
    %6 = arith.mulf %5, %1 : vector<64x128xf32>
    %cst_5 = arith.constant 1.000000e+00 : f32
    %7 = vector.broadcast %cst_5 : f32 to vector<64x128xf32>
    %8 = arith.addf %7, %6 : vector<64x128xf32>
    %9 = math.absf %0 : vector<64x128xf32>
    %cst_6 = arith.constant 0.000000e+00 : f32
    %10 = vector.broadcast %cst_6 : f32 to vector<64x128xf32>
    %11 = arith.subf %10, %9 : vector<64x128xf32>
    %12 = math.exp %11 : vector<64x128xf32>
    %13 = math.log1p %12 : vector<64x128xf32>
    %cst_7 = arith.constant 1.000000e+00 : f32
    %14 = vector.broadcast %cst_7 : f32 to vector<64x128xf32>
    %15 = arith.subf %14, %1 : vector<64x128xf32>
    %16 = arith.mulf %15, %0 : vector<64x128xf32>
    %cst_8 = arith.constant 0.000000e+00 : f32
    %17 = vector.broadcast %cst_8 : f32 to vector<64x128xf32>
    %18 = arith.subf %17, %0 : vector<64x128xf32>
    %cst_9 = arith.constant 0.000000e+00 : f32
    %19 = vector.broadcast %cst_9 : f32 to vector<64x128xf32>
    %20 = arith.maximumf %18, %19 : vector<64x128xf32>
    %21 = arith.addf %13, %20 : vector<64x128xf32>
    %22 = arith.mulf %8, %21 : vector<64x128xf32>
    %23 = arith.addf %16, %22 : vector<64x128xf32>
    %24 = vector.shape_cast %23 : vector<64x128xf32> to vector<8x8x128xf32>
    %cst_10 = arith.constant dense<0.000000e+00> : vector<8x128xf32>
    %25 = vector.multi_reduction <add>, %24, %cst_10 [0] : vector<8x8x128xf32> to vector<8x128xf32>
    %26 = vector.shape_cast %25 : vector<8x128xf32> to vector<1x8x128xf32>
    %c0_11 = arith.constant 0 : index
    %c0_12 = arith.constant 0 : index
    %c0_13 = arith.constant 0 : index
    %27 = vector.load %arg4[%c0_11, %c0_12, %c0_13] : memref<1x8x128xf32, #tpu.memory_space<vmem>>, vector<1x8x128xf32>
    tpu.vector_store %arg4[%c0_11, %c0_12, %c0_13], %26 {strides = array<i32>} : memref<1x8x128xf32, #tpu.memory_space<vmem>>, vector<1x8x128xf32>,
    return
  }
  func.func @transform_0(%arg0: i32) -> (i32, i32) {
    %c0_i32 = arith.constant 0 : i32
    %c0_i32_0 = arith.constant 0 : i32
    return %arg0, %c0_i32 : i32, i32
  }
  func.func @transform_1(%arg0: i32) -> (i32, i32) {
    %c0_i32 = arith.constant 0 : i32
    %c0_i32_0 = arith.constant 0 : i32
    return %arg0, %c0_i32 : i32, i32
  }
  func.func @transform_2(%arg0: i32) -> (i32, i32) {
    %c0_i32 = arith.constant 0 : i32
    %c0_i32_0 = arith.constant 0 : i32
    %c0_i32_1 = arith.constant 0 : i32
    return %c0_i32, %c0_i32_0 : i32, i32
  }
  func.func @transform_3(%arg0: i32) -> (i32, i32, i32) {
    %c0_i32 = arith.constant 0 : i32
    %c0_i32_0 = arith.constant 0 : i32
    %c0_i32_1 = arith.constant 0 : i32
    return %arg0, %c0_i32, %c0_i32_0 : i32, i32, i32
  }
}

</mosaic_0001>

<bundles_post_ra>
// kernel: tpu_custom_call.1
= control target key start
LH: loop header
LB: loop body
LE: loop exit
PB: predicated region body
PF: predicated region fallthrough
CT: control target
= control target key end

     0   :  { %8 = vsyncpa [#allocation3], 0  ;;  %s595_s0 = inlined_call_operand.hbm [shape: f32[64,128], index: 0, kind: input, shape index: {}]   ;;  %s596_s1 = inlined_call_operand.hbm [shape: f32[64,128], index: 1, kind: input, shape index: {}]   ;;  %s597_s2 = inlined_call_operand.vmem [shape: f32[1,128], index: 2, kind: input, shape index: {}]   ;;  %s598_s3 = inlined_call_operand.hbm [shape: f32[1,8,128], index: 3, kind: output, shape index: {}]  }
   0x1   :  { %9 = vsyncpa [#allocation6], 0 }
   0x2   :  { %10 = vsyncpa [#allocation4], 0  ;;  %s15_s14 = sshll.u32 %s595_s0, 4  ;;  %s386_s15 = smov [#allocation2]   ;;  %s16_s14 = int_to_ptr.hbm [resolvable:$true] %s15_s14 }
   0x3   :  { %s17_s16 = sshll.u32 %s386_s15, 4  ;;  %s28_s19 = sshll.u32 %s596_s1, 4  ;;  %s18_s16 = int_to_ptr.vmem [resolvable:$true] %s17_s16  ;;  %s29_s19 = int_to_ptr.hbm [resolvable:$true] %s28_s19 }
   0x4   :  { %s387_s20 = smov 128   ;;  %s388_s21 = smov 8  }
   0x5   :  { %23 = dma.hbm_to_vmem [thread:$0]  %s16_s14, 1024, %s18_s16, [#allocation3], %s387_s20, %s387_s20, %s388_s21  }
   0x6   :  { %s389_s22 = smov [#allocation5]  }
   0x7   :  { %s30_s23 = sshll.u32 %s389_s22, 4  ;;  %s31_s23 = int_to_ptr.vmem [resolvable:$true] %s30_s23 }
   0x8   :  { %36 = dma.hbm_to_vmem [thread:$0]  %s29_s19, 1024, %s31_s23, [#allocation6], %s387_s20, %s387_s20, %s388_s21  }
   0x9   :  { %380 = dma.done.wait [#allocation3], 1024  }
   0xa   :  { %381 = vsyncadd [#allocation3], 4294966272 }
   0xb   :  { %382 = dma.done.wait [#allocation6], 1024  }
   0xc   :  { %383 = vsyncadd [#allocation6], 4294966272  ;;  %v417_v0 = vld [vmem:[#allocation2] sm:$0xff]  ;;  %v419_v1 = vld [vmem:[#allocation2 + $0x8] sm:$0xff]  ;;  %s259_s27 = sshll.u32 %s598_s3, 4  ;;  %s260_s27 = int_to_ptr.hbm [resolvable:$true] %s259_s27 }
   0xd   :  { %v421_v2 = vld [vmem:[#allocation2 + $0x10] sm:$0xff]  ;;  %v423_v3 = vld [vmem:[#allocation2 + $0x18] sm:$0xff]  ;;  %v84_v4 = vand.u32 2147483647, %v417_v0  ;;  %v85_v5 = vand.u32 2147483647, %v419_v1 }
   0xe   :  { %v427_v6 = vld [vmem:[#allocation2 + $0x20] sm:$0xff]  ;;  %v429_v7 = vld [vmem:[#allocation2 + $0x28] sm:$0xff]  ;;  %v86_v8 = vand.u32 2147483647, %v421_v2  ;;  %v87_v10 = vand.u32 2147483647, %v423_v3 }
   0xf   :  { %v92_v9 = vsub.f32 0.0, %v84_v4  ;;  %v433_v11 = vld [vmem:[#allocation2 + $0x30] sm:$0xff]  ;;  %v435_v12 = vld [vmem:[#allocation2 + $0x38] sm:$0xff]  ;;  %v63_v13 = vld [vmem:[%s597_s2] sm:$0x1]  ;;  %v93_v17 = vsub.f32 0.0, %v85_v5 }
  0x10   :  { %v270_v14 = vadd.f32 -1.0, %v63_v13  ;;  %v88_v15 = vand.u32 2147483647, %v427_v6  ;;  %v89_v16 = vand.u32 2147483647, %v429_v7  ;;  %v94_v18 = vsub.f32 0.0, %v86_v8 }
  0x11   :  { %v100_v19 = vmul.f32 1.442695, %v92_v9  ;;  %v442_v20 = vld [vmem:[#allocation5] sm:$0xff]  ;;  %v90_v22 = vand.u32 2147483647, %v433_v11  ;;  %v95_v23 = vsub.f32 0.0, %v87_v10 }
  0x12   :  { %v66_v21 = vperm.slane %v270_v14, 0  ;;  %v445_v24 = vld [vmem:[#allocation5 + $0x8] sm:$0xff]  ;;  %v447_v25 = vld [vmem:[#allocation5 + $0x10] sm:$0xff]  ;;  %v91_v26 = vand.u32 2147483647, %v435_v12  ;;  %v450_v27 = vld [vmem:[#allocation5 + $0x18] sm:$0xff] }
  0x13   :  { %276 = vpow2.f32 %v100_v19  ;;  %v452_v28 = vld [vmem:[#allocation5 + $0x20] sm:$0xff]  ;;  %v96_v29 = vsub.f32 0.0, %v88_v15  ;;  %v97_v30 = vsub.f32 0.0, %v89_v16  ;;  %v102_v31 = vmul.f32 1.442695, %v93_v17  ;;  %v454_v32 = vld [vmem:[#allocation5 + $0x28] sm:$0xff] }
  0x14   :  { %v68_v33 = vmul.f32 %v66_v21, %v442_v20  ;;  %v104_v34 = vmul.f32 1.442695, %v94_v18  ;;  %v204_v35 = vsub.f32 0.0, %v417_v0  ;;  %v205_v36 = vsub.f32 0.0, %v419_v1  ;;  %v459_v37 = vld [vmem:[#allocation5 + $0x30] sm:$0xff]  ;;  %v461_v38 = vld [vmem:[#allocation5 + $0x38] sm:$0xff] }
  0x15   :  { %v69_v39 = vmul.f32 %v66_v21, %v445_v24  ;;  %v70_v40 = vmul.f32 %v66_v21, %v447_v25  ;;  %v98_v41 = vsub.f32 0.0, %v90_v22  ;;  %v106_v42 = vmul.f32 1.442695, %v95_v23  ;;  %s390_s2 = smov [#allocation7]  }
  0x16   :  { %v71_v43 = vmul.f32 %v66_v21, %v450_v27  ;;  %v72_v44 = vmul.f32 %v66_v21, %v452_v28  ;;  %v99_v45 = vsub.f32 0.0, %v91_v26  ;;  %v188_v46 = vsub.f32 1.0, %v442_v20  ;;  %s257_s24 = sshll.u32 %s390_s2, 4  ;;  %s258_s24 = int_to_ptr.vmem [resolvable:$true] %s257_s24 }
  0x17   :  { %v73_v47 = vmul.f32 %v66_v21, %v454_v32  ;;  %278 = vpow2.f32 %v102_v31  ;;  %v108_v48 = vmul.f32 1.442695, %v96_v29  ;;  %v110_v49 = vmul.f32 1.442695, %v97_v30 }
  0x18   :  { %v74_v51 = vmul.f32 %v66_v21, %v459_v37  ;;  %v471_v52 = vmul.f32 %v66_v21, %v461_v38  ;;  %v473_v53 = vadd.f32 1.0, %v68_v33  ;;  %280 = vpow2.f32 %v104_v34 }
  0x19   :  { %v277_v50 = vpop.eup %276  ;;  %v475_v54 = vadd.f32 1.0, %v69_v39  ;;  %v477_v55 = vadd.f32 1.0, %v70_v40  ;;  %282 = vpow2.f32 %v106_v42  ;;  %v112_v56 = vmul.f32 1.442695, %v98_v41 }
  0x1a   :  { %v479_v57 = vadd.f32 1.0, %v71_v43  ;;  %284 = vpow2.f32 %v108_v48  ;;  %v116_v58 = vadd.f32 1.0, %v277_v50  ;;  %v119_v59 = vmul.f32 -0.5, %v277_v50 }
  0x1b   :  { %v481_v60 = vadd.f32 1.0, %v72_v44  ;;  %286 = vpow2.f32 %v110_v49  ;;  %v114_v61 = vmul.f32 1.442695, %v99_v45  ;;  %v122_v62 = vand.u32 2147483647, %v277_v50 }
  0x1c   :  { %v483_v63 = vadd.f32 1.0, %v73_v47  ;;  %v485_v4 = vadd.f32 1.0, %v74_v51  ;;  %v189_v5 = vsub.f32 1.0, %v445_v24  ;;  %v190_v8 = vsub.f32 1.0, %v447_v25 }
  0x1d   :  { %v279_v9 = vpop.eup %278  ;;  %288 = vpow2.f32 %v112_v56  ;;  %v191_v10 = vsub.f32 1.0, %v450_v27  ;;  %v192_v13 = vsub.f32 1.0, %v452_v28  ;;  %v120_v16 = vadd.f32 1.0, %v119_v59 }
  0x1e   :  { %v281_v15 = vpop.eup %280  ;;  %290 = vlog2.f32 %v116_v58  ;;  %v125_v17 = vadd.f32 1.0, %v279_v9  ;;  %v128_v18 = vmul.f32 -0.5, %v279_v9  ;;  %vm492_vm0 = vcmp.lt.f32.partialorder %v122_v62, 0.0004427343 }
  0x1f   :  { %v283_v19 = vpop.eup %282  ;;  %292 = vpow2.f32 %v114_v61  ;;  %v131_v21 = vand.u32 2147483647, %v279_v9  ;;  %v134_v22 = vadd.f32 1.0, %v281_v15  ;;  %v137_v23 = vmul.f32 -0.5, %v281_v15 }
  0x20   :  { %v285_v24 = vpop.eup %284  ;;  %294 = vlog2.f32 %v125_v17  ;;  %v140_v25 = vand.u32 2147483647, %v281_v15  ;;  %v143_v26 = vadd.f32 1.0, %v283_v19  ;;  %v497_v29 = vmul.f32 %v188_v46, %v417_v0 }
  0x21   :  { %v287_v30 = vpop.eup %286  ;;  %v129_v31 = vadd.f32 1.0, %v128_v18  ;;  %296 = vlog2.f32 %v134_v22  ;;  %v138_v33 = vadd.f32 1.0, %v137_v23  ;;  %v146_v34 = vmul.f32 -0.5, %v283_v19 }
  0x22   :  { %298 = vlog2.f32 %v143_v26  ;;  %v149_v39 = vand.u32 2147483647, %v283_v19  ;;  %v152_v40 = vadd.f32 1.0, %v285_v24  ;;  %v500_v41 = vmul.f32 %v189_v5, %v419_v1 }
  0x23   :  { %v289_v42 = vpop.eup %288  ;;  %v502_v43 = vmul.f32 %v277_v50, %v120_v16  ;;  %vm504_vm1 = vcmp.lt.f32.partialorder %v131_v21, 0.0004427343  ;;  %v155_v45 = vmul.f32 -0.5, %v285_v24  ;;  %v509_v46 = vmul.f32 %v190_v8, %v421_v2 }
  0x24   :  { %v291_v47 = vpop.eup %290  ;;  %300 = vlog2.f32 %v152_v40  ;;  %v158_v48 = vand.u32 2147483647, %v285_v24  ;;  %v161_v49 = vadd.f32 1.0, %v287_v30  ;;  %v164_v51 = vmul.f32 -0.5, %v287_v30 }
  0x25   :  { %v293_v56 = vpop.eup %292  ;;  %v511_v58 = vmul.f32 %v279_v9, %v129_v31  ;;  %v513_v59 = vmul.f32 %v281_v15, %v138_v33  ;;  %vm515_vm2 = vcmp.lt.f32.partialorder %v140_v25, 0.0004427343  ;;  %v147_v61 = vadd.f32 1.0, %v146_v34 }
  0x26   :  { %v295_v62 = vpop.eup %294  ;;  %v118_v5 = vmul.f32 0.6931472, %v291_v47  ;;  %vm519_vm3 = vcmp.lt.f32.partialorder %v149_v39, 0.0004427343  ;;  %302 = vlog2.f32 %v161_v49  ;;  %v170_v16 = vadd.f32 1.0, %v289_v42 }
  0x27   :  { %v297_v17 = vpop.eup %296  ;;  %v156_v18 = vadd.f32 1.0, %v155_v45  ;;  %v165_v21 = vadd.f32 1.0, %v164_v51  ;;  %v167_v9 = vand.u32 2147483647, %v287_v30  ;;  %v173_v22 = vmul.f32 -0.5, %v289_v42 }
  0x28   :  { %v299_v15 = vpop.eup %298  ;;  %v127_v23 = vmul.f32 0.6931472, %v295_v62  ;;  %v136_v25 = vmul.f32 0.6931472, %v297_v17  ;;  %vm523_vm4 = vcmp.lt.f32.partialorder %v158_v48, 0.0004427343  ;;  %304 = vlog2.f32 %v170_v16 }
  0x29   :  { %v145_v31 = vmul.f32 0.6931472, %v299_v15  ;;  %v148_v33 = vmul.f32 %v283_v19, %v147_v61  ;;  %v174_v34 = vadd.f32 1.0, %v173_v22  ;;  %v176_v39 = vand.u32 2147483647, %v289_v42 }
  0x2a   :  { %v301_v40 = vpop.eup %300  ;;  %v124_v45 = vsel %vm492_vm0, %v502_v43, %v118_v5  ;;  %v179_v47 = vadd.f32 1.0, %v293_v56  ;;  %v182_v49 = vmul.f32 -0.5, %v293_v56  ;;  %v185_v51 = vand.u32 2147483647, %v293_v56 }
  0x2b   :  { %v154_v14 = vmul.f32 0.6931472, %v301_v40  ;;  %v157_v62 = vmul.f32 %v285_v24, %v156_v18  ;;  %v166_v17 = vmul.f32 %v287_v30, %v165_v21  ;;  %vm530_vm5 = vcmp.lt.f32.partialorder %v167_v9, 0.0004427343 }
  0x2c   :  { %v303_v16 = vpop.eup %302  ;;  %v133_v19 = vsel %vm504_vm1, %v511_v58, %v127_v23  ;;  %v142_v20 = vsel %vm515_vm2, %v513_v59, %v136_v25  ;;  %306 = vlog2.f32 %v179_v47  ;;  %v183_v43 = vadd.f32 1.0, %v182_v49 }
  0x2d   :  { %v151_v61 = vsel %vm519_vm3, %v148_v33, %v145_v31  ;;  %v175_v24 = vmul.f32 %v289_v42, %v174_v34  ;;  %vm542_vm6 = vcmp.lt.f32.partialorder %v176_v39, 0.0004427343  ;;  %vm546_vm7 = vcmp.lt.f32.partialorder %v185_v51, 0.0004427343 }
  0x2e   :  { %v305_v44 = vpop.eup %304  ;;  %v163_v58 = vmul.f32 0.6931472, %v303_v16  ;;  %v206_v18 = vsub.f32 0.0, %v421_v2  ;;  %v207_v59 = vsub.f32 0.0, %v423_v3  ;;  %v208_v50 = vsub.f32 0.0, %v427_v6 }
  0x2f   :  { %v160_v8 = vsel %vm523_vm4, %v157_v62, %v154_v14  ;;  %v184_v42 = vmul.f32 %v293_v56, %v183_v43  ;;  %v209_v21 = vsub.f32 0.0, %v429_v7  ;;  %v210_v9 = vsub.f32 0.0, %v433_v11 }
  0x30   :  { %v172_v22 = vmul.f32 0.6931472, %v305_v44  ;;  %v212_v15 = vmax.f32 %v204_v35, 0.0  ;;  %v213_v23 = vmax.f32 %v205_v36, 0.0  ;;  %v214_v2 = vmax.f32 %v206_v18, 0.0 }
  0x31   :  { %v211_v25 = vsub.f32 0.0, %v435_v12  ;;  %v215_v31 = vmax.f32 %v207_v59, 0.0  ;;  %v216_v33 = vmax.f32 %v208_v50, 0.0  ;;  %v217_v34 = vmax.f32 %v209_v21, 0.0 }
  0x32   :  { %v307_v26 = vpop.eup %306  ;;  %v169_v14 = vsel %vm530_vm5, %v166_v17, %v163_v58  ;;  %v218_v56 = vmax.f32 %v210_v9, 0.0  ;;  %v220_v39 = vadd.f32 %v212_v15, %v124_v45  ;;  %v221_v40 = vadd.f32 %v213_v23, %v133_v19 }
  0x33   :  { %v181_v47 = vmul.f32 0.6931472, %v307_v26  ;;  %v222_v49 = vadd.f32 %v214_v2, %v142_v20  ;;  %v223_v0 = vadd.f32 %v215_v31, %v151_v61  ;;  %v224_v35 = vadd.f32 %v216_v33, %v160_v8 }
  0x34   :  { %v178_v1 = vsel %vm542_vm6, %v175_v24, %v172_v22  ;;  %v199_v36 = vmul.f32 %v191_v10, %v423_v3  ;;  %v228_v51 = vmul.f32 %v220_v39, %v473_v53  ;;  %v229_v62 = vmul.f32 %v221_v40, %v475_v54 }
  0x35   :  { %v219_v48 = vmax.f32 %v211_v25, 0.0  ;;  %v225_v17 = vadd.f32 %v217_v34, %v169_v14  ;;  %v230_v45 = vmul.f32 %v222_v49, %v477_v55  ;;  %v231_v16 = vmul.f32 %v223_v0, %v479_v57 }
  0x36   :  { %v187_v19 = vsel %vm546_vm7, %v184_v42, %v181_v47  ;;  %v194_v20 = vsub.f32 1.0, %v459_v37  ;;  %v200_v27 = vmul.f32 %v192_v13, %v427_v6  ;;  %v236_v3 = vadd.f32 %v228_v51, %v497_v29 }
  0x37   :  { %v226_v53 = vadd.f32 %v218_v56, %v178_v1  ;;  %v232_v54 = vmul.f32 %v224_v35, %v481_v60  ;;  %v237_v10 = vadd.f32 %v229_v62, %v500_v41  ;;  %v238_v55 = vadd.f32 %v230_v45, %v509_v46 }
  0x38   :  { %v83_v57 = vadd.f32 1.0, %v471_v52  ;;  %v195_v43 = vsub.f32 1.0, %v461_v38  ;;  %v615_v37 = vsub.f32 1.0, %v454_v32  ;;  %v227_v24 = vadd.f32 %v219_v48, %v187_v19 }
  0x39   :  { %v233_v6 = vmul.f32 %v225_v17, %v483_v63  ;;  %v239_v28 = vadd.f32 %v231_v16, %v199_v36  ;;  %v244_v13 = vadd.f32 %v237_v10, %v236_v3  ;;  %v202_v29 = vmul.f32 %v194_v20, %v433_v11 }
  0x3a   :  { %v201_v61 = vmul.f32 %v615_v37, %v429_v7  ;;  %v234_v60 = vmul.f32 %v226_v53, %v485_v4  ;;  %v240_v41 = vadd.f32 %v232_v54, %v200_v27  ;;  %v203_v46 = vmul.f32 %v195_v43, %v435_v12 }
  0x3b   :  { %v245_v30 = vadd.f32 %v244_v13, %v238_v55  ;;  %v235_v52 = vmul.f32 %v227_v24, %v83_v57 }
  0x3c   :  { %v241_v5 = vadd.f32 %v233_v6, %v201_v61  ;;  %v242_v44 = vadd.f32 %v234_v60, %v202_v29 }
  0x3d   :  { %v246_v38 = vadd.f32 %v245_v30, %v239_v28  ;;  %v243_v32 = vadd.f32 %v235_v52, %v203_v46 }
  0x3f   :  { %v247_v58 = vadd.f32 %v246_v38, %v240_v41 }
  0x41   :  { %v248_v7 = vadd.f32 %v247_v58, %v241_v5 }
  0x43   :  { %v249_v11 = vadd.f32 %v248_v7, %v242_v44 }
  0x45   :  { %v250_v63 = vadd.f32 %v249_v11, %v243_v32 }
  0x47   :  { %251 = vst [vmem:[#allocation7] sm:$0xff] %v250_v63 }
  0x48   :  { %262 = dma.vmem_to_hbm [thread:$0]  %s258_s24, 128, %s260_s27, [#allocation4]  }
  0x49   :  { %384 = dma.done.wait [#allocation4], 128  }
  0x4a   :  { %385 = vsyncadd [#allocation4], 4294967168 }
  0x4b   :  { %267 = vsyncpa [#allocation3], 1 }
  0x4c   :  { %268 = vsyncpa [#allocation6], 1 }
  0x4d   :  { %269 = vsyncpa [#allocation4], 1 }

</bundles_post_ra>
